<compile_context>
chip_gen: v7x
topology: tpu7x:2x2x1
jax: 0.10.0
libtpu: 0.0.40
codegen_flags: <defaults>
</compile_context>

<pallas_src>
import jax
import jax.numpy as jnp
from jax import lax
from jax.experimental import pallas as pl
from jax.experimental.pallas import tpu as pltpu


def tcn_kernel(x_ref, pos_ref, w_ref, scale_ref, shift_ref, o_ref):
    # x_ref:     (Cin, TM)     bf16  - channels-first, batch-folded time on lanes
    # pos_ref:   (1, TM)       int32 - within-sequence time index of each column
    # w_ref:     (K*Cout, Cin) bf16  - conv taps stacked along the output dim
    # scale_ref: (Cout, 1)     f32   - folded BN scale
    # shift_ref: (Cout, 1)     f32   - folded conv-bias + BN shift
    # o_ref:     (Cout, TM)    f32
    kcout = w_ref.shape[0]
    cout, tm = o_ref.shape
    k_taps = kcout // cout
    lane_aligned = (tm % 128 == 0)

    # Single MXU matmul on the unshifted input: all K taps at once (f32 acc).
    y_all = jnp.dot(w_ref[...], x_ref[...], preferred_element_type=jnp.float32)

    pos = pos_ref[...]                                     # (1, TM)

    if not lane_aligned:
        # Narrow/unaligned tiles (tiny shapes): shift via a one-hot matrix
        # (always lowers); production tiles take the pltpu.roll path below.
        src = lax.broadcasted_iota(jnp.int32, (tm, tm), 0)
        dst = lax.broadcasted_iota(jnp.int32, (tm, tm), 1)

    # Tap k = K-1 has zero shift.
    acc = y_all[(k_taps - 1) * cout:, :]
    for k in range(k_taps - 1):
        s = k_taps - 1 - k                                 # causal shift of tap k
        yk = y_all[k * cout:(k + 1) * cout, :]             # aligned sublane slice
        if lane_aligned:
            yk = pltpu.roll(yk, shift=s, axis=1)           # XLU lane rotate
        else:
            sh = (src + s == dst).astype(jnp.float32)      # column c -> c+s
            yk = jnp.dot(yk, sh, preferred_element_type=jnp.float32)
        # Zero columns whose within-sequence index < s: removes both the
        # left-padding taps and any cross-sequence leakage inside the tile.
        acc = acc + jnp.where(pos >= s, yk, 0.0)

    out = acc * scale_ref[...] + shift_ref[...]            # conv bias + BN (eval)
    o_ref[...] = jnp.maximum(out, 0.0).astype(o_ref.dtype)  # ReLU; Dropout = id


def _choose_batches_per_tile(B, L, target_cols=2048):
    """TB whole sequences per grid step: tile lane width (TB*L) must be a
    multiple of 128 or span the whole array; prefer >=2 grid steps (megacore)
    and tiles of roughly `target_cols` columns."""
    divs = [d for d in range(1, B + 1) if B % d == 0]
    cands = [d for d in divs if (d * L) % 128 == 0] or [B]
    multi = [d for d in cands if B // d >= 2]
    pool = multi if multi else cands
    under = [d for d in pool if d * L <= target_cols]
    return max(under) if under else min(pool)


def temporal_conv_forward(x, w, conv_bias, gamma, beta, running_mean, running_var,
                          eps=1e-5):
    """x: [B, L, Cin] float32, w: [Cout, Cin, K] (PyTorch Conv1d layout)."""
    B, L, Cin = x.shape
    Cout, _, K = w.shape

    # ---- Parameter / layout glue (plain JAX, outside the kernel) ----
    scale = gamma / jnp.sqrt(running_var + eps)                  # (Cout,)
    shift = (conv_bias - running_mean) * scale + beta            # (Cout,)
    scale2 = scale.reshape(Cout, 1).astype(jnp.float32)
    shift2 = shift.reshape(Cout, 1).astype(jnp.float32)

    # Tap-stacked weights: rows [k*Cout:(k+1)*Cout] = W_k ; bf16 for the MXU.
    w_s = jnp.transpose(w, (2, 0, 1)).reshape(K * Cout, Cin).astype(jnp.bfloat16)

    # Channels-first with batch folded into the lane-dense time axis; bf16 traffic.
    x_t = jnp.transpose(x, (2, 0, 1)).reshape(Cin, B * L).astype(jnp.bfloat16)

    # Within-sequence time index of every column (used to mask causal taps).
    pos = (jnp.arange(B * L, dtype=jnp.int32) % L).reshape(1, B * L)

    # ---- Tiling: TB whole sequences per grid step ----
    tb = _choose_batches_per_tile(B, L)
    tm = tb * L
    grid = (B // tb,)

    cost = pl.CostEstimate(
        flops=2 * B * L * Cin * Cout * K,
        transcendentals=0,
        bytes_accessed=(Cin * B * L * 2          # x (bf16)
                        + B * L * 4              # pos (i32)
                        + K * Cout * Cin * 2     # weights (bf16)
                        + 2 * Cout * 4           # scale/shift
                        + Cout * B * L * 4),     # output (f32)
    )

    y_t = pl.pallas_call(
        tcn_kernel,
        out_shape=jax.ShapeDtypeStruct((Cout, B * L), jnp.float32),
        grid_spec=pltpu.PrefetchScalarGridSpec(
            num_scalar_prefetch=0,
            grid=grid,
            in_specs=[
                pl.BlockSpec((Cin, tm), lambda g: (0, g)),        # x
                pl.BlockSpec((1, tm), lambda g: (0, g)),          # pos
                pl.BlockSpec((K * Cout, Cin), lambda g: (0, 0)),  # weights
                pl.BlockSpec((Cout, 1), lambda g: (0, 0)),        # scale
                pl.BlockSpec((Cout, 1), lambda g: (0, 0)),        # shift
            ],
            out_specs=pl.BlockSpec((Cout, tm), lambda g: (0, g)),
        ),
        compiler_params=pltpu.CompilerParams(
            dimension_semantics=("parallel",),
            vmem_limit_bytes=64 * 1024 * 1024,
        ),
        cost_estimate=cost,
    )(x_t, pos, w_s, scale2, shift2)

    # [Cout, B*L] -> [B, L, Cout]
    y = jnp.transpose(y_t.reshape(Cout, B, L), (1, 2, 0))
    return y.astype(x.dtype)


def reference_forward(x, w, conv_bias, gamma, beta, running_mean, running_var,
                      eps=1e-5):
    """Pure-JAX reference matching PyTorch eval-mode forward exactly."""
    B, L, Cin = x.shape
    Cout, _, K = w.shape
    pad = K - 1
    xp = jnp.pad(x, ((0, 0), (pad, pad), (0, 0)))
    y = jnp.zeros((B, L, Cout), jnp.float32)
    for k in range(K):
        # keeping t in [0, L) of the full conv output == trimming the last K-1 steps
        y = y + jnp.einsum('bti,oi->bto', xp[:, k:k + L, :], w[:, :, k],
                           precision=lax.Precision.HIGHEST)
    y = y + conv_bias
    y = (y - running_mean) / jnp.sqrt(running_var + eps) * gamma + beta
    return jnp.maximum(y, 0.0)


def _run_case(key, B, L, Cin, Cout, K=3):
    kx, kw, kb, kg, kbe, km, kv = jax.random.split(key, 7)
    x = jax.random.normal(kx, (B, L, Cin), dtype=jnp.float32)
    w = jax.random.normal(kw, (Cout, Cin, K), dtype=jnp.float32) * 0.1
    conv_bias = jax.random.normal(kb, (Cout,), dtype=jnp.float32) * 0.1
    gamma = 1.0 + 0.1 * jax.random.normal(kg, (Cout,), dtype=jnp.float32)
    beta = 0.1 * jax.random.normal(kbe, (Cout,), dtype=jnp.float32)
    running_mean = 0.1 * jax.random.normal(km, (Cout,), dtype=jnp.float32)
    running_var = 0.5 + jax.random.uniform(kv, (Cout,), dtype=jnp.float32)

    out = temporal_conv_forward(x, w, conv_bias, gamma, beta,
                                running_mean, running_var)
    out = jax.block_until_ready(out)
    assert out.shape == (B, L, Cout)

    # Tight check vs a reference that uses the same bf16-quantized inputs
    # (isolates kernel math from the bf16 cast).
    xq = x.astype(jnp.bfloat16).astype(jnp.float32)
    wq = w.astype(jnp.bfloat16).astype(jnp.float32)
    ref_q = reference_forward(xq, wq, conv_bias, gamma, beta,
                              running_mean, running_var)
    assert jnp.allclose(out, ref_q, atol=2e-3, rtol=2e-3), \
        "mismatch vs bf16-quantized-input reference"

    # Looser sanity check vs the full-f32 reference (bf16 input quantization).
    ref = reference_forward(x, w, conv_bias, gamma, beta,
                            running_mean, running_var)
    assert jnp.allclose(out, ref, atol=5e-2, rtol=5e-2), \
        "mismatch vs f32 reference"


if __name__ == "__main__":
    key = jax.random.PRNGKey(0)
    k1, k2 = jax.random.split(key)
    # Toy module shapes (single tile, narrow-lane fallback path).
    _run_case(k1, B=2, L=16, Cin=4, Cout=8)
    # Lane-aligned, multi-grid-step path (exercises real tiling + pltpu.roll).
    _run_case(k2, B=4, L=128, Cin=8, Cout=16)
    print("KERNEL_OK")
</pallas_src>

<mosaic_0001>
module attributes {stable_mosaic.version = 11 : i64} {
  func.func @tcn_kernel(%arg0: i32, %arg1: memref<4x32xbf16, #tpu.memory_space<vmem>>, %arg2: memref<1x32xi32, #tpu.memory_space<vmem>>, %arg3: memref<24x4xbf16, #tpu.memory_space<vmem>>, %arg4: memref<8x1xf32, #tpu.memory_space<vmem>>, %arg5: memref<8x1xf32, #tpu.memory_space<vmem>>, %arg6: memref<8x32xf32, #tpu.memory_space<vmem>>) attributes {dimension_semantics = [#tpu.dimension_semantics<parallel>], iteration_bounds = array<i64: 1>, scalar_prefetch = 0 : i64, scratch_operands = 0 : i64, tpu.core_type = #tpu.core_type<tc>, window_params = [{transform_indices = @transform_0, window_bounds = array<i64: 4, 32>}, {transform_indices = @transform_1, window_bounds = array<i64: 1, 32>}, {pipeline_mode = #tpu.pipeline_mode<synchronous>, transform_indices = @transform_2, window_bounds = array<i64: 24, 4>}, {pipeline_mode = #tpu.pipeline_mode<synchronous>, transform_indices = @transform_3, window_bounds = array<i64: 8, 1>}, {pipeline_mode = #tpu.pipeline_mode<synchronous>, transform_indices = @transform_4, window_bounds = array<i64: 8, 1>}, {transform_indices = @transform_5, window_bounds = array<i64: 8, 32>}]} {
    %c0 = arith.constant 0 : index
    %c0_0 = arith.constant 0 : index
    %0 = vector.load %arg3[%c0, %c0_0] : memref<24x4xbf16, #tpu.memory_space<vmem>>, vector<24x4xbf16>
    %c0_1 = arith.constant 0 : index
    %c0_2 = arith.constant 0 : index
    %1 = vector.load %arg1[%c0_1, %c0_2] : memref<4x32xbf16, #tpu.memory_space<vmem>>, vector<4x32xbf16>
    %cst = arith.constant dense<0.000000e+00> : vector<24x32xf32>
    %2 = tpu.matmul %0, %1, %cst {dimension_numbers = #tpu.dot_dimension_numbers<[1], [0], [0], [1], [0, 0, 1, 1], [], []>} : vector<24x4xbf16>, vector<4x32xbf16>, vector<24x32xf32> -> vector<24x32xf32>
    %c0_3 = arith.constant 0 : index
    %c0_4 = arith.constant 0 : index
    %3 = vector.load %arg2[%c0_3, %c0_4] : memref<1x32xi32, #tpu.memory_space<vmem>>, vector<1x32xi32>
    %4 = tpu.iota {dimensions = array<i32: 0>} : vector<32x32xi32>
    %5 = tpu.iota {dimensions = array<i32: 1>} : vector<32x32xi32>
    %6 = vector.extract_strided_slice %2 {offsets = [16, 0], sizes = [8, 32], strides = [1, 1]} : vector<24x32xf32> to vector<8x32xf32>
    %7 = vector.extract_strided_slice %2 {offsets = [0, 0], sizes = [8, 32], strides = [1, 1]} : vector<24x32xf32> to vector<8x32xf32>
    %c2_i32 = arith.constant 2 : i32
    %8 = vector.broadcast %c2_i32 : i32 to vector<32x32xi32>
    %9 = arith.addi %4, %8 : vector<32x32xi32>
    %10 = arith.cmpi eq, %9, %5 : vector<32x32xi32>
    %11 = arith.extui %10 : vector<32x32xi1> to vector<32x32xi32>
    %12 = arith.sitofp %11 : vector<32x32xi32> to vector<32x32xf32>
    %cst_5 = arith.constant dense<0.000000e+00> : vector<8x32xf32>
    %13 = tpu.matmul %7, %12, %cst_5 {dimension_numbers = #tpu.dot_dimension_numbers<[1], [0], [0], [1], [0, 0, 1, 1], [], []>} : vector<8x32xf32>, vector<32x32xf32>, vector<8x32xf32> -> vector<8x32xf32>
    %c2_i32_6 = arith.constant 2 : i32
    %14 = vector.broadcast %c2_i32_6 : i32 to vector<1x32xi32>
    %15 = arith.cmpi sge, %3, %14 : vector<1x32xi32>
    %cst_7 = arith.constant 0.000000e+00 : f32
    %16 = vector.shape_cast %15 : vector<1x32xi1> to vector<1x32xi1>
    %17 = vector.broadcast %16 : vector<1x32xi1> to vector<8x32xi1>
    %18 = vector.broadcast %cst_7 : f32 to vector<8x32xf32>
    %19 = arith.select %17, %13, %18 : vector<8x32xi1>, vector<8x32xf32>
    %20 = arith.addf %6, %19 : vector<8x32xf32>
    %21 = vector.extract_strided_slice %2 {offsets = [8, 0], sizes = [8, 32], strides = [1, 1]} : vector<24x32xf32> to vector<8x32xf32>
    %c1_i32 = arith.constant 1 : i32
    %22 = vector.broadcast %c1_i32 : i32 to vector<32x32xi32>
    %23 = arith.addi %4, %22 : vector<32x32xi32>
    %24 = arith.cmpi eq, %23, %5 : vector<32x32xi32>
    %25 = arith.extui %24 : vector<32x32xi1> to vector<32x32xi32>
    %26 = arith.sitofp %25 : vector<32x32xi32> to vector<32x32xf32>
    %cst_8 = arith.constant dense<0.000000e+00> : vector<8x32xf32>
    %27 = tpu.matmul %21, %26, %cst_8 {dimension_numbers = #tpu.dot_dimension_numbers<[1], [0], [0], [1], [0, 0, 1, 1], [], []>} : vector<8x32xf32>, vector<32x32xf32>, vector<8x32xf32> -> vector<8x32xf32>
    %c1_i32_9 = arith.constant 1 : i32
    %28 = vector.broadcast %c1_i32_9 : i32 to vector<1x32xi32>
    %29 = arith.cmpi sge, %3, %28 : vector<1x32xi32>
    %cst_10 = arith.constant 0.000000e+00 : f32
    %30 = vector.shape_cast %29 : vector<1x32xi1> to vector<1x32xi1>
    %31 = vector.broadcast %30 : vector<1x32xi1> to vector<8x32xi1>
    %32 = vector.broadcast %cst_10 : f32 to vector<8x32xf32>
    %33 = arith.select %31, %27, %32 : vector<8x32xi1>, vector<8x32xf32>
    %34 = arith.addf %20, %33 : vector<8x32xf32>
    %c0_11 = arith.constant 0 : index
    %c0_12 = arith.constant 0 : index
    %35 = vector.load %arg4[%c0_11, %c0_12] : memref<8x1xf32, #tpu.memory_space<vmem>>, vector<8x1xf32>
    %36 = vector.broadcast %35 : vector<8x1xf32> to vector<8x32xf32>
    %37 = arith.mulf %34, %36 : vector<8x32xf32>
    %c0_13 = arith.constant 0 : index
    %c0_14 = arith.constant 0 : index
    %38 = vector.load %arg5[%c0_13, %c0_14] : memref<8x1xf32, #tpu.memory_space<vmem>>, vector<8x1xf32>
    %39 = vector.broadcast %38 : vector<8x1xf32> to vector<8x32xf32>
    %40 = arith.addf %37, %39 : vector<8x32xf32>
    %cst_15 = arith.constant 0.000000e+00 : f32
    %41 = vector.broadcast %cst_15 : f32 to vector<8x32xf32>
    %42 = arith.maximumf %40, %41 : vector<8x32xf32>
    %c0_16 = arith.constant 0 : index
    %c0_17 = arith.constant 0 : index
    %43 = vector.load %arg6[%c0_16, %c0_17] : memref<8x32xf32, #tpu.memory_space<vmem>>, vector<8x32xf32>
    tpu.vector_store %arg6[%c0_16, %c0_17], %42 {strides = array<i32>} : memref<8x32xf32, #tpu.memory_space<vmem>>, vector<8x32xf32>,
    return
  }
  func.func @transform_0(%arg0: i32) -> (i32, i32) {
    %c0_i32 = arith.constant 0 : i32
    %c0_i32_0 = arith.constant 0 : i32
    return %c0_i32, %arg0 : i32, i32
  }
  func.func @transform_1(%arg0: i32) -> (i32, i32) {
    %c0_i32 = arith.constant 0 : i32
    %c0_i32_0 = arith.constant 0 : i32
    return %c0_i32, %arg0 : i32, i32
  }
  func.func @transform_2(%arg0: i32) -> (i32, i32) {
    %c0_i32 = arith.constant 0 : i32
    %c0_i32_0 = arith.constant 0 : i32
    %c0_i32_1 = arith.constant 0 : i32
    return %c0_i32, %c0_i32_0 : i32, i32
  }
  func.func @transform_3(%arg0: i32) -> (i32, i32) {
    %c0_i32 = arith.constant 0 : i32
    %c0_i32_0 = arith.constant 0 : i32
    %c0_i32_1 = arith.constant 0 : i32
    return %c0_i32, %c0_i32_0 : i32, i32
  }
  func.func @transform_4(%arg0: i32) -> (i32, i32) {
    %c0_i32 = arith.constant 0 : i32
    %c0_i32_0 = arith.constant 0 : i32
    %c0_i32_1 = arith.constant 0 : i32
    return %c0_i32, %c0_i32_0 : i32, i32
  }
  func.func @transform_5(%arg0: i32) -> (i32, i32) {
    %c0_i32 = arith.constant 0 : i32
    %c0_i32_0 = arith.constant 0 : i32
    return %c0_i32, %arg0 : i32, i32
  }
}

</mosaic_0001>

<bundles_post_ra>
// kernel: tpu_custom_call.1
= control target key start
LH: loop header
LB: loop body
LE: loop exit
PB: predicated region body
PF: predicated region fallthrough
CT: control target
= control target key end

     0   :  { %10 = vsyncpa [#allocation3], 0  ;;  %s758_s0 = inlined_call_operand.hbm [shape: bf16[4,32], index: 0, kind: input, shape index: {}]   ;;  %s759_s1 = inlined_call_operand.hbm [shape: s32[1,32], index: 1, kind: input, shape index: {}]   ;;  %s760_s2 = inlined_call_operand.hbm [shape: bf16[24,4], index: 2, kind: input, shape index: {}]   ;;  %s761_s3 = inlined_call_operand.hbm [shape: f32[8,1], index: 3, kind: input, shape index: {}]   ;;  %s762_s4 = inlined_call_operand.hbm [shape: f32[8,1], index: 4, kind: input, shape index: {}]   ;;  %s763_s5 = inlined_call_operand.hbm [shape: f32[8,32], index: 5, kind: output, shape index: {}]  }
   0x1   :  { %11 = vsyncpa [#allocation6], 0 }
   0x2   :  { %12 = vsyncpa [#allocation9], 0 }
   0x3   :  { %13 = vsyncpa [#allocation4], 0  ;;  %s623_s18 = smov [#allocation5]   ;;  %s624_s20 = smov [#allocation8]  }
   0x4   :  { %s30_s19 = sshll.u32 %s623_s18, 4  ;;  %s52_s21 = sshll.u32 %s624_s20, 4  ;;  %s31_s19 = int_to_ptr.vmem [resolvable:$true] %s30_s19  ;;  %s53_s21 = int_to_ptr.vmem [resolvable:$true] %s52_s21 }
   0x5   :  { %s483_s24 = scalar_lea.hbm %s759_s1, 16 }
   0x6   :  { %p484_p0 = scmp.ne.s32.totalorder %s759_s1, %s483_s24  ;;  %p487_p1 = scmp.lt.u32.totalorder %s483_s24, %s759_s1 }
   0x8   :  { %p489_p2 = pnand %p487_p1, %p484_p0 }
   0xa   :  { %492 = shalt.err (!%p489_p2)
}
   0xb   :  { %s493_s29 = scalar_lea.vmem %s31_s19, 16  ;;  %s497_s30 = scalar_lea.vmem %s31_s19, 32 }
   0xc   :  { %p494_p3 = scmp.ne.s32.totalorder %s31_s19, %s493_s29  ;;  %p498_p4 = scmp.lt.s32.totalorder %s31_s19, %s31_s19 }
   0xd   :  { %p499_p5 = scmp.lt.s32.totalorder %s497_s30, %s493_s29 }
   0xf   :  { %p500_p6 = por %p499_p5, %p498_p4 }
  0x11   :  { %p501_p7 = pnand %p500_p6, %p494_p3 }
  0x13   :  { %504 = shalt.err (!%p501_p7)
}
  0x14   :  { %33 = dma.hbm_to_vmem [thread:$0]  %s759_s1, 16, %s31_s19, [#allocation6]  }
  0x15   :  { %s505_s10 = scalar_lea.hbm %s761_s3, 128 }
  0x16   :  { %p506_p8 = scmp.ne.s32.totalorder %s761_s3, %s505_s10  ;;  %p509_p9 = scmp.lt.u32.totalorder %s505_s10, %s761_s3 }
  0x18   :  { %p511_p10 = pnand %p509_p9, %p506_p8 }
  0x1a   :  { %514 = shalt.err (!%p511_p10)
}
  0x1b   :  { %s515_s15 = scalar_lea.vmem %s53_s21, 128  ;;  %p520_p12 = scmp.lt.s32.totalorder %s53_s21, %s53_s21 }
  0x1c   :  { %p516_p11 = scmp.ne.s32.totalorder %s53_s21, %s515_s15  ;;  %p521_p13 = scmp.lt.s32.totalorder %s515_s15, %s515_s15 }
  0x1e   :  { %p522_p0 = por %p521_p13, %p520_p12 }
  0x20   :  { %p523_p1 = pnand %p522_p0, %p516_p11 }
  0x22   :  { %526 = shalt.err (!%p523_p1)
}
  0x23   :  { %55 = dma.hbm_to_vmem [thread:$0]  %s761_s3, 128, %s53_s21, [#allocation9]  }
  0x24   :  { %s625_s17 = smov [#allocation2]   ;;  %s626_s19 = smov [#allocation7]  }
  0x25   :  { %s20_s18 = sshll.u32 %s625_s17, 4  ;;  %s39_s20 = sshll.u32 %s626_s19, 4  ;;  %s21_s18 = int_to_ptr.vmem [resolvable:$true] %s20_s18  ;;  %s690_s20 = int_to_ptr.vmem [resolvable:$true] %s39_s20 }
  0x26   :  { %s527_s24 = scalar_lea.hbm %s758_s0, 32 }
  0x27   :  { %p528_p2 = scmp.ne.s32.totalorder %s758_s0, %s527_s24  ;;  %p531_p3 = scmp.lt.u32.totalorder %s527_s24, %s758_s0 }
  0x29   :  { %p533_p4 = pnand %p531_p3, %p528_p2 }
  0x2b   :  { %536 = shalt.err (!%p533_p4)
}
  0x2c   :  { %s537_s3 = scalar_lea.vmem %s21_s18, 32  ;;  %p542_p6 = scmp.lt.s32.totalorder %s21_s18, %s21_s18 }
  0x2d   :  { %p538_p5 = scmp.ne.s32.totalorder %s21_s18, %s537_s3  ;;  %p543_p7 = scmp.lt.s32.totalorder %s537_s3, %s537_s3 }
  0x2f   :  { %p544_p8 = por %p543_p7, %p542_p6 }
  0x31   :  { %p545_p9 = pnand %p544_p8, %p538_p5 }
  0x33   :  { %548 = shalt.err (!%p545_p9)
}
  0x34   :  { %23 = dma.hbm_to_vmem [thread:$0]  %s758_s0, 32, %s21_s18, [#allocation3]  }
  0x35   :  { %s549_s7 = scalar_lea.hbm %s760_s2, 192 }
  0x36   :  { %p550_p10 = scmp.ne.s32.totalorder %s760_s2, %s549_s7  ;;  %p553_p11 = scmp.lt.u32.totalorder %s549_s7, %s760_s2 }
  0x38   :  { %p555_p12 = pnand %p553_p11, %p550_p10 }
  0x3a   :  { %558 = shalt.err (!%p555_p12)
}
  0x3b   :  { %s559_s12 = scalar_lea.vmem %s690_s20, 192  ;;  %p564_p0 = scmp.lt.s32.totalorder %s690_s20, %s690_s20 }
  0x3c   :  { %p560_p13 = scmp.ne.s32.totalorder %s690_s20, %s559_s12  ;;  %p565_p1 = scmp.lt.s32.totalorder %s559_s12, %s559_s12 }
  0x3e   :  { %p566_p2 = por %p565_p1, %p564_p0 }
  0x40   :  { %p567_p3 = pnand %p566_p2, %p560_p13 }
  0x42   :  { %570 = shalt.err (!%p567_p3)
}
  0x43   :  { %s627_s0 = smov 64   ;;  %s628_s13 = smov 4  }
  0x44   :  { %45 = dma.hbm_to_vmem [thread:$0]  %s760_s2, 192, %s690_s20, [#allocation6], %s627_s0, %s627_s0, %s628_s13  }
  0x45   :  { %s629_s1 = smov [#allocation10]   ;;  %s571_s19 = scalar_lea.hbm %s762_s4, 128 }
  0x46   :  { %s62_s16 = sshll.u32 %s629_s1, 4  ;;  %p572_p4 = scmp.ne.s32.totalorder %s762_s4, %s571_s19  ;;  %s63_s16 = int_to_ptr.vmem [resolvable:$true] %s62_s16 }
  0x47   :  { %p575_p5 = scmp.lt.u32.totalorder %s571_s19, %s762_s4 }
  0x49   :  { %p577_p6 = pnand %p575_p5, %p572_p4 }
  0x4b   :  { %580 = shalt.err (!%p577_p6)
}
  0x4c   :  { %s581_s26 = scalar_lea.vmem %s63_s16, 128  ;;  %p586_p8 = scmp.lt.s32.totalorder %s63_s16, %s63_s16 }
  0x4d   :  { %p582_p7 = scmp.ne.s32.totalorder %s63_s16, %s581_s26  ;;  %p587_p9 = scmp.lt.s32.totalorder %s581_s26, %s581_s26 }
  0x4f   :  { %p588_p10 = por %p587_p9, %p586_p8 }
  0x51   :  { %p589_p11 = pnand %p588_p10, %p582_p7 }
  0x53   :  { %592 = shalt.err (!%p589_p11)
}
  0x54   :  { %65 = dma.hbm_to_vmem [thread:$0]  %s762_s4, 128, %s63_s16, [#allocation9]  }
  0x55   :  { %615 = dma.done.wait [#allocation3], 32  }
  0x56   :  { %616 = vsyncadd [#allocation3], 4294967264 }
  0x57   :  { %617 = dma.done.wait [#allocation6], 208  }
  0x58   :  { %618 = vsyncadd [#allocation6], 4294967088 }
  0x59   :  { %619 = dma.done.wait [#allocation9], 256  }
  0x5a   :  { %620 = vsyncadd [#allocation9], 4294967040  ;;  %v154_v0 = vlaneseq  ;;  %v630_v1 = vmov 0.0|0.0   ;;  %vm101_vm0 = vcmask 1041408   ;;  %vm94_vm1 = vcmask 31744   ;;  %v481_v13 = vld [vmem:[#allocation7] sm:$0xff]  }
  0x5b   :  { %454 = vmatprep.subr.bf16.mxu1 %v630_v1  ;;  %v85_v11 = vld [vmem:[#allocation2] sm:$0x3]  ;;  %v482_v14 = vld [vmem:[#allocation7 + $0x8] ss:$0 sps:$4 sm:$0xff]   ;;  %428 = vmatprep.mubr.msk.bf16.mxu0 %vm94_vm1, %v481_v13  ;;  %v631_v17 = vmov 1.0|1.0  }
  0x5c   :  { %v733_v2 = vshrl.u32 %v154_v0, 7  ;;  %v160_v3 = vand.u32 127, %v154_v0  ;;  %466 = vmatprep.subr.msk.bf16.mxu0 %vm101_vm0, %v85_v11  ;;  %v103_v12 = vsel %vm101_vm0, %v85_v11, 0  ;;  %vm632_vm14 = vmmov 0   ;;  %v358_v21 = vld [vmem:[#allocation8] sm:$0xff]  ;;  %v365_v23 = vld [vmem:[#allocation10] sm:$0xff] }
  0x5d   :  { %427 = vmatpush3.bf16.msra.mxu0 %v103_v12  ;;  %v633_v20 = vmov 0.0   ;;  %v634_v22 = vmov 0   ;;  %vm177_vm15 = vcmask 261120   ;;  %v153_v28 = vld [vmem:[#allocation5] sm:$0x1]  ;;  %s635_s4 = smov [#allocation11]  }
  0x5e   :  { %v156_v4 = vadd.s32 8, %v733_v2  ;;  %v161_v5 = vadd.s32 2, %v733_v2  ;;  %v260_v6 = vadd.s32 1, %v733_v2  ;;  %v157_v7 = vadd.s32 16, %v733_v2  ;;  %460 = vmatprep.subr.bf16.mxu0 %v630_v1  ;;  %440 = vmatprep.mubr.msk.f32.mxu1 %vm632_vm14, %v633_v20  ;;  %s380_s27 = sshll.u32 %s635_s4, 4  ;;  %s381_s27 = int_to_ptr.vmem [resolvable:$true] %s380_s27 }
  0x5f   :  { %v158_v8 = vadd.s32 24, %v733_v2  ;;  %480 = vset.pattern.permute.xlu0 %v634_v22  ;;  %vm251_vm0 = vcmp.ge.s32.totalorder %v153_v28, 2  ;;  %v255_v29 = vsub.s32 0, %v733_v2  ;;  %s593_s28 = scalar_lea.vmem %s381_s27, 128  ;;  %p598_p13 = scmp.lt.s32.totalorder %s381_s27, %s381_s27 }
  0x60   :  { %v162_v9 = vadd.s32 2, %v156_v4  ;;  %vm165_vm2 = vcmp.eq.s32.totalorder %v161_v5, %v160_v3  ;;  %v261_v10 = vadd.s32 1, %v156_v4  ;;  %vm264_vm3 = vcmp.eq.s32.totalorder %v260_v6, %v160_v3  ;;  %429 = vmatmul.mubr.msk.bf16.vlgmr.msra.gmra.mrb[0].mxu0 %vm94_vm1, %v482_v14  ;;  %361 = vperm.xlu0 %480, %v358_v21   ;;  %p594_p12 = scmp.ne.s32.totalorder %s381_s27, %s593_s28  ;;  %p599_p0 = scmp.lt.s32.totalorder %s593_s28, %s593_s28 }
  0x61   :  { %v163_v15 = vadd.s32 2, %v157_v7  ;;  %v164_v16 = vadd.s32 2, %v158_v8  ;;  %v262_v18 = vadd.s32 1, %v157_v7  ;;  %v263_v19 = vadd.s32 1, %v158_v8  ;;  %451 = vmatprep.mubr.msk.f32.mxu0 %vm632_vm14, %v633_v20 }
  0x62   :  { %vm166_vm4 = vcmp.eq.s32.totalorder %v162_v9, %v160_v3  ;;  %vm265_vm5 = vcmp.eq.s32.totalorder %v261_v10, %v160_v3  ;;  %vm349_vm1 = vcmp.ge.s32.totalorder %v153_v28, 1  ;;  %v252_v30 = vsel %vm251_vm0, 1, %v634_v22  ;;  %p600_p1 = por %p599_p0, %p598_p13 }
  0x63   :  { %vm455_vm6 = vmpackc.low %vm166_vm4, %vm165_vm2  ;;  %vm167_vm8 = vcmp.eq.s32.totalorder %v163_v15, %v160_v3  ;;  %vm168_vm9 = vcmp.eq.s32.totalorder %v164_v16, %v160_v3  ;;  %vm266_vm11 = vcmp.eq.s32.totalorder %v262_v18, %v160_v3  ;;  %vm267_vm12 = vcmp.eq.s32.totalorder %v263_v19, %v160_v3 }
  0x64   :  { %456 = vmatpush3.bf16.msk.msra.mxu1 %vm455_vm6, %v631_v17  ;;  %vm461_vm7 = vmpackc.low %vm265_vm5, %vm264_vm3  ;;  %368 = vperm.xlu0 %480, %v365_v23   ;;  %v350_v31 = vsel %vm349_vm1, 1, %v634_v22  ;;  %v256_v32 = vrot.slane %v252_v30, %v255_v29  ;;  %p601_p2 = pnand %p600_p1, %p594_p12 }
  0x65   :  { %457 = vmatprep.subr.bf16.mxu1 %v630_v1  ;;  %vm458_vm10 = vmpackc.low %vm168_vm9, %vm167_vm8  ;;  %462 = vmatpush3.bf16.msk.msra.mxu0 %vm461_vm7, %v631_v17  ;;  %v354_v33 = vrot.slane %v350_v31, %v255_v29 }
  0x66   :  { %463 = vmatprep.subr.bf16.mxu0 %v630_v1  ;;  %vm464_vm13 = vmpackc.low %vm267_vm12, %vm266_vm11  ;;  %vm257_vm2 = vcmp.eq.s32.totalorder %v256_v32, 1 }
  0x67   :  { %vm355_vm3 = vcmp.eq.s32.totalorder %v354_v33, 1 }
  0x68   :  { %459 = vmatpush3.bf16.msk.msra.mxu1 %vm458_vm10, %v631_v17 }
  0x69   :  { %465 = vmatpush3.bf16.msk.msra.mxu0 %vm464_vm13, %v631_v17 }
  0xdf   :  { %v362_v35 = vpop.permute.xlu0 %361 }
  0xe3   :  { %v369_v44 = vpop.permute.xlu0 %368 }
 0x133   :  { %v430_v24 = vpop.f32.mrb[0].mxu0 }
 0x134   :  { %v139_v25 = vpop.f32.mrb[1].mxu0 }
 0x135   :  { %v431_v26 = vpop.f32.mrb[2].mxu0  ;;  %441 = vmatmul.mubr.msk.f32.vlgmr.msra.gmra.mrb[0].mxu1 %vm177_vm15, %v139_v25 }
 0x136   :  { %v142_v27 = vpop.f32.mrb[3].mxu0 }
 0x137   :  { %452 = vmatmul.mubr.msk.f32.vlgmr.msra.gmra.mrb[4].mxu0 %vm177_vm15, %v142_v27 }
 0x208   :  { %v247_v34 = vpop.f32.mrb[0].mxu1 }
 0x209   :  { %v258_v36 = vsel %vm257_vm2, %v247_v34, 0.0  ;;  %v442_v37 = vpop.f32.mrb[1].mxu1 }
 0x20a   :  { %v259_v38 = vadd.f32 %v430_v24, %v258_v36  ;;  %v345_v39 = vpop.f32.mrb[4].mxu0 }
 0x20b   :  { %v356_v40 = vsel %vm355_vm3, %v345_v39, 0.0  ;;  %v453_v41 = vpop.f32.mrb[5].mxu0 }
 0x20c   :  { %v357_v42 = vadd.f32 %v356_v40, %v259_v38 }
 0x20e   :  { %v364_v43 = vmul.f32 %v362_v35, %v357_v42 }
 0x210   :  { %v371_v45 = vadd.f32 %v369_v44, %v364_v43 }
 0x212   :  { %v372_v46 = vmax.f32 %v371_v45, 0.0 }
 0x214   :  { %373 = vst.msk [vmem:[#allocation11] sm:$0xff] %vm177_vm15, %v372_v46 }
 0x215   :  { %604 = shalt.err (!%p601_p2)
}
 0x216   :  { %s605_s29 = scalar_lea.hbm %s763_s5, 128 }
 0x217   :  { %p606_p3 = scmp.ne.s32.totalorder %s763_s5, %s605_s29  ;;  %p609_p4 = scmp.lt.u32.totalorder %s605_s29, %s763_s5 }
 0x219   :  { %p611_p5 = pnand %p609_p4, %p606_p3 }
 0x21b   :  { %614 = shalt.err (!%p611_p5)
}
 0x21c   :  { %383 = dma.vmem_to_hbm [thread:$0]  %s381_s27, 128, %s763_s5, [#allocation4]  }
 0x21d   :  { %621 = dma.done.wait [#allocation4], 128  }
 0x21e   :  { %622 = vsyncadd [#allocation4], 4294967168 }
 0x21f   :  { %387 = vsyncpa [#allocation3], 1 }
 0x220   :  { %388 = vsyncpa [#allocation6], 1 }
 0x221   :  { %389 = vsyncpa [#allocation9], 1 }
 0x222   :  { %390 = vsyncpa [#allocation4], 1 }

</bundles_post_ra>
